<compile_context>
chip_gen: v7x
topology: tpu7x:2x2x1
jax: 0.10.0
libtpu: 0.0.40
codegen_flags: <defaults>
</compile_context>

<pallas_src>
import functools

import jax
import jax.numpy as jnp
from jax import lax
from jax.experimental import pallas as pl
from jax.experimental.pallas import tpu as pltpu


def _round_up(n, m):
    return ((n + m - 1) // m) * m


def _channel_norm_kernel(x_ref, p_ref, o_ref, *, epsilon):
    # x_ref: (bB, C, tT) tile — C on sublanes, T on lanes.
    # p_ref: (2, C, 1)    — p_ref[0] = weight, p_ref[1] = bias (resident).
    x = x_ref[...].astype(jnp.float32)
    c = x.shape[1]
    w = p_ref[0].astype(jnp.float32)[None]                 # (1, C, 1)
    b = p_ref[1].astype(jnp.float32)[None]                 # (1, C, 1)

    mean = jnp.mean(x, axis=1, keepdims=True)              # (bB, 1, tT)  XLU
    diff = x - mean
    # unbiased variance (torch.var default): divide by C - 1
    var = jnp.sum(diff * diff, axis=1, keepdims=True) / (c - 1)
    inv_std = lax.rsqrt(var + epsilon)                     # EUP slot
    o_ref[...] = (diff * inv_std * w + b).astype(o_ref.dtype)


def _choose_tiles(B, C, T, itemsize):
    """Pick (bB, tT) from a per-step VMEM budget, independent of generation."""
    # Sublane packing: f32 -> 8, bf16 -> 16, int8/fp8 -> 32.
    sub = 8 * max(1, 4 // itemsize)
    c_pad = _round_up(C, sub)

    budget_bytes = 12 * 1024 * 1024          # fits v5e/v6e/v7x scoped defaults
    # 2x in + 2x out pipeline buffers (native dtype) + ~4 f32 body temporaries.
    bytes_per_elem = 4 * itemsize + 16
    max_elems = budget_bytes // bytes_per_elem

    if T <= 128:
        # Full-T block (equals array dim -> exempt from the 128 lane rule).
        t_t = T
    else:
        t_t = max(128, (max_elems // c_pad) // 128 * 128)
        t_t = min(t_t, _round_up(T, 128))
        # Keep >= ~4 total grid steps so both v7x TensorCores get work.
        min_t_steps = max(1, -(-4 // B))
        t_t = min(t_t, max(128, _round_up(pl.cdiv(T, min_t_steps), 128)))

    # For small C, block several batch rows per step to get big contiguous DMAs.
    b_b = max(1, min(B, max_elems // max(1, c_pad * t_t)))

    est_vmem = b_b * c_pad * max(t_t, 128) * bytes_per_elem \
        + 2 * 2 * c_pad * 128 * itemsize     # double-buffered resident params
    return b_b, t_t, est_vmem


def channel_norm(x, weight=None, bias=None, epsilon=1e-5):
    """x: (B, C, T); weight, bias: (1, C, 1) or None (-> identity affine)."""
    B, C, T = x.shape

    if weight is None:
        weight = jnp.ones((1, C, 1), dtype=x.dtype)
    if bias is None:
        bias = jnp.zeros((1, C, 1), dtype=x.dtype)

    # Single (2, C, 1) parameter array -> one resident BlockSpec pipeline.
    params = jnp.concatenate(
        [weight.reshape(1, C, 1), bias.reshape(1, C, 1)], axis=0
    )

    itemsize = jnp.dtype(x.dtype).itemsize
    bB, tT, est_vmem = _choose_tiles(B, C, T, itemsize)

    kernel = functools.partial(_channel_norm_kernel, epsilon=epsilon)

    cp_kwargs = dict(dimension_semantics=("parallel", "parallel"))
    # Only raise the scoped VMEM limit when the budget estimate actually needs
    # it (very large C); 48 MiB is safe on v5e/v6e (128 MiB) and v7x (64 MiB).
    if est_vmem > 14 * 1024 * 1024:
        cp_kwargs["vmem_limit_bytes"] = min(2 * est_vmem, 48 * 1024 * 1024)

    out = pl.pallas_call(
        kernel,
        out_shape=jax.ShapeDtypeStruct((B, C, T), x.dtype),
        grid_spec=pltpu.PrefetchScalarGridSpec(
            num_scalar_prefetch=0,
            grid=(pl.cdiv(B, bB), pl.cdiv(T, tT)),
            in_specs=[
                # x tile: (bB, C, tT) per (batch-tile, time-tile) grid point.
                pl.BlockSpec((bB, C, tT), lambda b, t: (b, 0, t)),
                # params: constant index_map -> stays resident in VMEM.
                pl.BlockSpec((2, C, 1), lambda b, t: (0, 0, 0)),
            ],
            out_specs=pl.BlockSpec((bB, C, tT), lambda b, t: (b, 0, t)),
        ),
        compiler_params=pltpu.CompilerParams(**cp_kwargs),
    )(x, params)

    return out


def channel_norm_ref(x, weight, bias, epsilon=1e-5):
    """Pure-JAX reference matching the PyTorch forward."""
    x32 = x.astype(jnp.float32)
    c = x.shape[1]
    mean = jnp.mean(x32, axis=1, keepdims=True)
    var = jnp.sum((x32 - mean) ** 2, axis=1, keepdims=True) / (c - 1)
    y = (x32 - mean) * lax.rsqrt(var + epsilon)
    y = y * weight.astype(jnp.float32) + bias.astype(jnp.float32)
    return y.astype(x.dtype)


if __name__ == "__main__":
    key = jax.random.PRNGKey(0)

    # --- small shape implied by the module (B=2, C=4, T=16), default params ---
    B, C, T = 2, 4, 16
    x = jax.random.normal(key, (B, C, T), dtype=jnp.float32)
    # reset_parameters(): weight = ones, bias = zeros, shapes (1, C, 1).
    weight = jnp.ones((1, C, 1), dtype=jnp.float32)
    bias = jnp.zeros((1, C, 1), dtype=jnp.float32)

    out = jax.block_until_ready(channel_norm(x, weight, bias, epsilon=1e-5))
    ref = channel_norm_ref(x, weight, bias, epsilon=1e-5)
    assert out.shape == (B, C, T)
    assert jnp.allclose(out, ref, atol=1e-5, rtol=1e-5)

    # --- ragged T (not a multiple of 128): exercises the masked last tile ---
    B2, C2, T2 = 2, 64, 2300
    x2 = jax.random.normal(jax.random.PRNGKey(1), (B2, C2, T2), jnp.float32)
    w2 = jax.random.normal(jax.random.PRNGKey(2), (1, C2, 1), jnp.float32)
    b2 = jax.random.normal(jax.random.PRNGKey(3), (1, C2, 1), jnp.float32)
    out2 = jax.block_until_ready(channel_norm(x2, w2, b2))
    ref2 = channel_norm_ref(x2, w2, b2)
    assert out2.shape == (B2, C2, T2)
    assert jnp.allclose(out2, ref2, atol=1e-4, rtol=1e-4)

    # --- bf16 I/O end-to-end (no caller-side cast): halves HBM traffic ---
    B3, C3, T3 = 2, 32, 384
    x3 = jax.random.normal(
        jax.random.PRNGKey(4), (B3, C3, T3), jnp.float32
    ).astype(jnp.bfloat16)
    w3 = jnp.ones((1, C3, 1), dtype=jnp.bfloat16)
    b3 = jnp.zeros((1, C3, 1), dtype=jnp.bfloat16)
    out3 = jax.block_until_ready(channel_norm(x3, w3, b3))
    ref3 = channel_norm_ref(x3, w3, b3)
    assert out3.dtype == jnp.bfloat16
    assert jnp.allclose(
        out3.astype(jnp.float32), ref3.astype(jnp.float32), atol=2e-2, rtol=2e-2
    )

    print("KERNEL_OK")
</pallas_src>

<mosaic_0001>
module attributes {stable_mosaic.version = 11 : i64} {
  func.func @_channel_norm_kernel(%arg0: i32, %arg1: i32, %arg2: memref<2x4x16xf32, #tpu.memory_space<vmem>>, %arg3: memref<2x4x1xf32, #tpu.memory_space<vmem>>, %arg4: memref<2x4x16xf32, #tpu.memory_space<vmem>>) attributes {dimension_semantics = [#tpu.dimension_semantics<parallel>, #tpu.dimension_semantics<parallel>], iteration_bounds = array<i64: 1, 1>, scalar_prefetch = 0 : i64, scratch_operands = 0 : i64, tpu.core_type = #tpu.core_type<tc>, window_params = [{transform_indices = @transform_0, window_bounds = array<i64: 2, 4, 16>}, {pipeline_mode = #tpu.pipeline_mode<synchronous>, transform_indices = @transform_1, window_bounds = array<i64: 2, 4, 1>}, {transform_indices = @transform_2, window_bounds = array<i64: 2, 4, 16>}]} {
    %c0 = arith.constant 0 : index
    %c0_0 = arith.constant 0 : index
    %c0_1 = arith.constant 0 : index
    %0 = vector.load %arg2[%c0, %c0_0, %c0_1] : memref<2x4x16xf32, #tpu.memory_space<vmem>>, vector<2x4x16xf32>
    %c0_2 = arith.constant 0 : index
    %c0_3 = arith.constant 0 : index
    %c0_4 = arith.constant 0 : index
    %1 = vector.load %arg3[%c0_2, %c0_3, %c0_4] : memref<2x4x1xf32, #tpu.memory_space<vmem>>, vector<1x4x1xf32>
    %2 = vector.shape_cast %1 : vector<1x4x1xf32> to vector<4x1xf32>
    %3 = vector.shape_cast %2 : vector<4x1xf32> to vector<1x4x1xf32>
    %c1 = arith.constant 1 : index
    %c0_5 = arith.constant 0 : index
    %c0_6 = arith.constant 0 : index
    %4 = vector.load %arg3[%c1, %c0_5, %c0_6] : memref<2x4x1xf32, #tpu.memory_space<vmem>>, vector<1x4x1xf32>
    %5 = vector.shape_cast %4 : vector<1x4x1xf32> to vector<4x1xf32>
    %6 = vector.shape_cast %5 : vector<4x1xf32> to vector<1x4x1xf32>
    %cst = arith.constant dense<0.000000e+00> : vector<2x16xf32>
    %7 = vector.multi_reduction <add>, %0, %cst [1] : vector<2x4x16xf32> to vector<2x16xf32>
    %8 = vector.shape_cast %7 : vector<2x16xf32> to vector<2x1x16xf32>
    %cst_7 = arith.constant 4.000000e+00 : f32
    %9 = vector.broadcast %cst_7 : f32 to vector<2x1x16xf32>
    %10 = arith.divf %8, %9 : vector<2x1x16xf32>
    %11 = vector.broadcast %10 : vector<2x1x16xf32> to vector<2x4x16xf32>
    %12 = arith.subf %0, %11 : vector<2x4x16xf32>
    %13 = arith.mulf %12, %12 : vector<2x4x16xf32>
    %cst_8 = arith.constant dense<0.000000e+00> : vector<2x16xf32>
    %14 = vector.multi_reduction <add>, %13, %cst_8 [1] : vector<2x4x16xf32> to vector<2x16xf32>
    %15 = vector.shape_cast %14 : vector<2x16xf32> to vector<2x1x16xf32>
    %cst_9 = arith.constant 3.000000e+00 : f32
    %16 = vector.broadcast %cst_9 : f32 to vector<2x1x16xf32>
    %17 = arith.divf %15, %16 : vector<2x1x16xf32>
    %cst_10 = arith.constant 9.99999974E-6 : f32
    %18 = vector.broadcast %cst_10 : f32 to vector<2x1x16xf32>
    %19 = arith.addf %17, %18 : vector<2x1x16xf32>
    %20 = math.rsqrt %19 : vector<2x1x16xf32>
    %21 = vector.broadcast %20 : vector<2x1x16xf32> to vector<2x4x16xf32>
    %22 = arith.mulf %12, %21 : vector<2x4x16xf32>
    %23 = vector.broadcast %3 : vector<1x4x1xf32> to vector<2x4x16xf32>
    %24 = arith.mulf %22, %23 : vector<2x4x16xf32>
    %25 = vector.broadcast %6 : vector<1x4x1xf32> to vector<2x4x16xf32>
    %26 = arith.addf %24, %25 : vector<2x4x16xf32>
    %c0_11 = arith.constant 0 : index
    %c0_12 = arith.constant 0 : index
    %c0_13 = arith.constant 0 : index
    %27 = vector.load %arg4[%c0_11, %c0_12, %c0_13] : memref<2x4x16xf32, #tpu.memory_space<vmem>>, vector<2x4x16xf32>
    tpu.vector_store %arg4[%c0_11, %c0_12, %c0_13], %26 {strides = array<i32>} : memref<2x4x16xf32, #tpu.memory_space<vmem>>, vector<2x4x16xf32>,
    return
  }
  func.func @transform_0(%arg0: i32, %arg1: i32) -> (i32, i32, i32) {
    %c0_i32 = arith.constant 0 : i32
    %c0_i32_0 = arith.constant 0 : i32
    return %arg0, %c0_i32, %arg1 : i32, i32, i32
  }
  func.func @transform_1(%arg0: i32, %arg1: i32) -> (i32, i32, i32) {
    %c0_i32 = arith.constant 0 : i32
    %c0_i32_0 = arith.constant 0 : i32
    %c0_i32_1 = arith.constant 0 : i32
    %c0_i32_2 = arith.constant 0 : i32
    return %c0_i32, %c0_i32_0, %c0_i32_1 : i32, i32, i32
  }
  func.func @transform_2(%arg0: i32, %arg1: i32) -> (i32, i32, i32) {
    %c0_i32 = arith.constant 0 : i32
    %c0_i32_0 = arith.constant 0 : i32
    return %arg0, %c0_i32, %arg1 : i32, i32, i32
  }
}

</mosaic_0001>

<bundles_post_ra>
// kernel: tpu_custom_call.1
= control target key start
LH: loop header
LB: loop body
LE: loop exit
PB: predicated region body
PF: predicated region fallthrough
CT: control target
= control target key end

     0   :  { %v128_v1 = vmov 0   ;;  %s177_s0 = inlined_call_operand.vmem [shape: f32[2,4,16], index: 0, kind: input, shape index: {}]   ;;  %s178_s1 = inlined_call_operand.vmem [shape: f32[2,4,1], index: 1, kind: input, shape index: {}]   ;;  %s179_s2 = inlined_call_operand.hbm [shape: f32[2,4,16], index: 2, kind: output, shape index: {}]  }
   0x1   :  { %v14_v0 = vld [vmem:[%s178_s1] sm:$0xf]  ;;  %99 = vset.pattern.permute.xlu0 %v128_v1 }
   0x2   :  { %7 = vsyncpa [#allocation3], 0  ;;  %64 = vperm.xlu0 %99, %v14_v0   ;;  %v94_v2 = vld [vmem:[%s178_s1 + $0x4] sm:$0xf]  ;;  %vm17_vm0 = vcmask 125952  }
   0x3   :  { %v12_v3 = vld [vmem:[%s177_s0] sm:$0xf]  ;;  %v13_v4 = vld [vmem:[%s177_s0 + $0x4] sm:$0xf]  ;;  %s129_s0 = smov [#allocation2]  }
   0x4   :  { %v18_v5 = vsel %vm17_vm0, %v12_v3, 0.0  ;;  %v25_v6 = vsel %vm17_vm0, %v13_v4, 0.0  ;;  %s83_s1 = sshll.u32 %s129_s0, 4  ;;  %s84_s1 = int_to_ptr.vmem [resolvable:$true] %s83_s1 }
   0x5   :  { %v19_v7 = vrot.slane %v18_v5, 4  ;;  %v26_v8 = vrot.slane %v25_v6, 4  ;;  %s104_s17 = scalar_lea.vmem %s84_s1, 128  ;;  %p109_p1 = scmp.lt.s32.totalorder %s84_s1, %s84_s1 }
   0x6   :  { %71 = vperm.xlu0 %99, %v94_v2   ;;  %p105_p0 = scmp.ne.s32.totalorder %s84_s1, %s104_s17  ;;  %p110_p2 = scmp.lt.s32.totalorder %s104_s17, %s104_s17 }
   0x7   :  { %v20_v9 = vadd.f32 %v19_v7, %v18_v5  ;;  %v27_v10 = vadd.f32 %v26_v8, %v25_v6 }
   0x8   :  { %p111_p3 = por %p110_p2, %p109_p1 }
   0x9   :  { %v21_v11 = vrot.slane %v20_v9, 2  ;;  %v28_v12 = vrot.slane %v27_v10, 2 }
   0xa   :  { %p112_p4 = pnand %p111_p3, %p105_p0 }
   0xb   :  { %v22_v13 = vadd.f32 %v21_v11, %v20_v9  ;;  %v29_v14 = vadd.f32 %v28_v12, %v27_v10 }
   0xd   :  { %v23_v15 = vrot.slane %v22_v13, 1  ;;  %v30_v16 = vrot.slane %v29_v14, 1 }
   0xf   :  { %v24_v17 = vadd.f32 %v23_v15, %v22_v13  ;;  %v31_v18 = vadd.f32 %v30_v16, %v29_v14 }
  0x11   :  { %v33_v19 = vmul.f32 0.25, %v24_v17  ;;  %v34_v20 = vmul.f32 0.25, %v31_v18 }
  0x13   :  { %v35_v21 = vsub.f32 %v12_v3, %v33_v19  ;;  %v36_v22 = vsub.f32 %v13_v4, %v34_v20 }
  0x15   :  { %v37_v23 = vmul.f32 %v35_v21, %v35_v21  ;;  %v38_v24 = vmul.f32 %v36_v22, %v36_v22 }
  0x17   :  { %v39_v25 = vsel %vm17_vm0, %v37_v23, 0.0  ;;  %v46_v26 = vsel %vm17_vm0, %v38_v24, 0.0 }
  0x18   :  { %v40_v27 = vrot.slane %v39_v25, 4  ;;  %v47_v28 = vrot.slane %v46_v26, 4 }
  0x1a   :  { %v41_v29 = vadd.f32 %v40_v27, %v39_v25  ;;  %v48_v30 = vadd.f32 %v47_v28, %v46_v26 }
  0x1c   :  { %v42_v31 = vrot.slane %v41_v29, 2  ;;  %v49_v32 = vrot.slane %v48_v30, 2 }
  0x1e   :  { %v43_v33 = vadd.f32 %v42_v31, %v41_v29  ;;  %v50_v34 = vadd.f32 %v49_v32, %v48_v30 }
  0x20   :  { %v44_v35 = vrot.slane %v43_v33, 1  ;;  %v51_v36 = vrot.slane %v50_v34, 1 }
  0x22   :  { %v45_v37 = vadd.f32 %v44_v35, %v43_v33  ;;  %v52_v38 = vadd.f32 %v51_v36, %v50_v34 }
  0x24   :  { %v54_v39 = vmul.f32 0.33333334, %v45_v37  ;;  %v55_v40 = vmul.f32 0.33333334, %v52_v38 }
  0x26   :  { %v56_v41 = vadd.f32 1e-05, %v54_v39  ;;  %v57_v42 = vadd.f32 1e-05, %v55_v40 }
  0x28   :  { %100 = vrsqrt.f32 %v56_v41 }
  0x29   :  { %102 = vrsqrt.f32 %v57_v42 }
  0x32   :  { %v101_v43 = vpop.eup %100 }
  0x33   :  { %v103_v44 = vpop.eup %102  ;;  %v60_v45 = vmul.f32 %v101_v43, %v35_v21 }
  0x34   :  { %v61_v46 = vmul.f32 %v103_v44, %v36_v22 }
  0x81   :  { %v65_v47 = vpop.permute.xlu0 %64 }
  0x82   :  { %v67_v48 = vmul.f32 %v65_v47, %v60_v45  ;;  %v68_v49 = vmul.f32 %v65_v47, %v61_v46 }
  0x85   :  { %v72_v50 = vpop.permute.xlu0 %71 }
  0x86   :  { %v74_v51 = vadd.f32 %v72_v50, %v67_v48  ;;  %v75_v52 = vadd.f32 %v72_v50, %v68_v49 }
  0x88   :  { %76 = vst.msk [vmem:[#allocation2] sm:$0xf] %vm17_vm0, %v74_v51  ;;  %77 = vst.msk [vmem:[#allocation2 + $0x4] sm:$0xf] %vm17_vm0, %v75_v52 }
  0x89   :  { %115 = shalt.err (!%p112_p4)
}
  0x8a   :  { %s116_s20 = scalar_lea.hbm %s179_s2, 128 }
  0x8b   :  { %p117_p5 = scmp.ne.s32.totalorder %s179_s2, %s116_s20  ;;  %p120_p6 = scmp.lt.u32.totalorder %s116_s20, %s179_s2 }
  0x8d   :  { %p122_p7 = pnand %p120_p6, %p117_p5 }
  0x8f   :  { %125 = shalt.err (!%p122_p7)
}
  0x90   :  { %s130_s25 = smov 64   ;;  %s131_s26 = smov 4  }
  0x91   :  { %89 = dma.vmem_to_hbm [thread:$0]  %s84_s1, 128, %s179_s2, [#allocation3], %s130_s25, %s130_s25, %s131_s26  }
  0x92   :  { %126 = dma.done.wait [#allocation3], 128  }
  0x93   :  { %127 = vsyncadd [#allocation3], 4294967168 }
  0x94   :  { %93 = vsyncpa [#allocation3], 1 }

</bundles_post_ra>
